<compile_context>
chip_gen: v5e
topology: v5e:2x2
jax: 0.10.0
libtpu: 0.0.40
codegen_flags: <defaults>
</compile_context>

<pallas_src>
import jax
import jax.numpy as jnp
from jax.experimental import pallas as pl
from jax.experimental.pallas import tpu as pltpu

INPUT_SIZE = 4
HIDDEN_SIZE = 20
NUM_CLASSES = 3
NUM_LAYERS = 1                      # single-layer GRU (matches the PyTorch module)
LANE = 128                          # one vreg lane-block; each gate padded to this
K_IN = INPUT_SIZE + HIDDEN_SIZE + 1 # 25 = rows of the fused weight ([x | h | 1])
N_BLOCKS = 5                        # r | z | gi_n | gh_n | h pass-through


def gru_fc_kernel(xh1_ref, w_ref, fcw_ref, fcb_ref, out_ref):
    """One GRU step + FC head, everything resident in VMEM.

    xh1_ref : (1, 25)       -> [x | h | 1]  (trailing 1 activates the bias row)
    w_ref   : (25, 5*128)   -> [W_r | W_z | W_in | W_hn | I_h], biases in row 24
    fcw_ref : (128, 128)    -> fc.weight^T zero-padded
    fcb_ref : (1, 128)      -> fc.bias zero-padded
    out_ref : (1, 2*128)    -> lanes [0,128): logits (0..2 valid)
                               lanes [128,256): new hidden (0..19 valid)
    """
    xh1 = xh1_ref[...]

    # Single MXU pass: biased gate pre-activations + padded copy of h.
    g = jnp.dot(xh1, w_ref[...], preferred_element_type=jnp.float32)

    # 128-aligned, whole-vreg slices.
    pre_r = g[:, 0 * LANE:1 * LANE]
    pre_z = g[:, 1 * LANE:2 * LANE]
    gi_n = g[:, 2 * LANE:3 * LANE]
    gh_n = g[:, 3 * LANE:4 * LANE]
    h_old = g[:, 4 * LANE:5 * LANE]          # zero-padded h, via identity block

    r = jax.nn.sigmoid(pre_r)
    z = jax.nn.sigmoid(pre_z)
    n = jnp.tanh(gi_n + r * gh_n)
    h_new = n + z * (h_old - n)              # == (1-z)*n + z*h; padded lanes stay 0

    logits = jnp.dot(h_new, fcw_ref[...],
                     preferred_element_type=jnp.float32) + fcb_ref[...]

    out_ref[:, 0 * LANE:1 * LANE] = logits
    out_ref[:, 1 * LANE:2 * LANE] = h_new


def prepare_params(params):
    """One-time parameter packing: fuse / transpose / pad everything for the kernel."""
    H = HIDDEN_SIZE
    w_ih = params["w_ih"].astype(jnp.float32)   # (3H, IN), gate order r,z,n
    w_hh = params["w_hh"].astype(jnp.float32)   # (3H, H)
    b_ih = params["b_ih"].astype(jnp.float32)   # (3H,)
    b_hh = params["b_hh"].astype(jnp.float32)   # (3H,)

    wih_r, wih_z, wih_n = w_ih[:H], w_ih[H:2 * H], w_ih[2 * H:]
    whh_r, whh_z, whh_n = w_hh[:H], w_hh[H:2 * H], w_hh[2 * H:]

    BIAS_ROW = INPUT_SIZE + H                   # row activated by the trailing 1

    w = jnp.zeros((K_IN, N_BLOCKS * LANE), jnp.float32)
    # block 0: r-gate preact = x@Wih_r^T + h@Whh_r^T + (b_ih_r + b_hh_r)
    w = w.at[:INPUT_SIZE, 0 * LANE:0 * LANE + H].set(wih_r.T)
    w = w.at[INPUT_SIZE:BIAS_ROW, 0 * LANE:0 * LANE + H].set(whh_r.T)
    w = w.at[BIAS_ROW, 0 * LANE:0 * LANE + H].set(b_ih[:H] + b_hh[:H])
    # block 1: z-gate preact
    w = w.at[:INPUT_SIZE, 1 * LANE:1 * LANE + H].set(wih_z.T)
    w = w.at[INPUT_SIZE:BIAS_ROW, 1 * LANE:1 * LANE + H].set(whh_z.T)
    w = w.at[BIAS_ROW, 1 * LANE:1 * LANE + H].set(b_ih[H:2 * H] + b_hh[H:2 * H])
    # block 2: gi_n (input contribution + b_in)
    w = w.at[:INPUT_SIZE, 2 * LANE:2 * LANE + H].set(wih_n.T)
    w = w.at[BIAS_ROW, 2 * LANE:2 * LANE + H].set(b_ih[2 * H:])
    # block 3: gh_n (hidden contribution + b_hn)
    w = w.at[INPUT_SIZE:BIAS_ROW, 3 * LANE:3 * LANE + H].set(whh_n.T)
    w = w.at[BIAS_ROW, 3 * LANE:3 * LANE + H].set(b_hh[2 * H:])
    # block 4: identity pass-through of h (lane-padded h copy for the kernel)
    w = w.at[INPUT_SIZE:BIAS_ROW, 4 * LANE:4 * LANE + H].set(
        jnp.eye(H, dtype=jnp.float32))

    fcw = jnp.zeros((LANE, LANE), jnp.float32)
    fcw = fcw.at[:H, :NUM_CLASSES].set(params["fc_w"].T.astype(jnp.float32))
    fcb = jnp.zeros((1, LANE), jnp.float32)
    fcb = fcb.at[0, :NUM_CLASSES].set(params["fc_b"].astype(jnp.float32))

    return {"w_comb": w, "fc_w": fcw, "fc_b": fcb}


def rnn_forward(x, hidden_state, prepped):
    """Equivalent of RNN.forward(x, hidden_state) from the PyTorch module.

    x            : any array with INPUT_SIZE elements (viewed as (1,1,-1))
    hidden_state : (NUM_LAYERS=1, 1, HIDDEN_SIZE)
    returns (out, hidden): out (1, NUM_CLASSES), hidden (1, 1, HIDDEN_SIZE)
    """
    x2 = x.reshape(1, INPUT_SIZE).astype(jnp.float32)
    # NOTE: hard-assumes NUM_LAYERS == 1, same as the PyTorch module's usage.
    h2 = hidden_state.reshape(1, HIDDEN_SIZE).astype(jnp.float32)
    one = jnp.ones((1, 1), jnp.float32)
    xh1 = jnp.concatenate([x2, h2, one], axis=1)            # (1, 25)

    vmem_spec = pl.BlockSpec(memory_space=pltpu.VMEM)
    out_pad = pl.pallas_call(
        gru_fc_kernel,
        out_shape=jax.ShapeDtypeStruct((1, 2 * LANE), jnp.float32),
        in_specs=[vmem_spec] * 4,
        out_specs=vmem_spec,
    )(xh1, prepped["w_comb"], prepped["fc_w"], prepped["fc_b"])

    out = out_pad[:, :NUM_CLASSES]
    hidden = out_pad[:, LANE:LANE + HIDDEN_SIZE].reshape(NUM_LAYERS, 1, HIDDEN_SIZE)
    return out, hidden


def rnn_forward_ref(x, hidden_state, params):
    """Pure-JAX reference (PyTorch GRU semantics) for a correctness check."""
    x2 = x.reshape(1, INPUT_SIZE).astype(jnp.float32)
    h = hidden_state.reshape(1, HIDDEN_SIZE).astype(jnp.float32)
    gi = x2 @ params["w_ih"].T + params["b_ih"]
    gh = h @ params["w_hh"].T + params["b_hh"]
    H = HIDDEN_SIZE
    r = jax.nn.sigmoid(gi[:, :H] + gh[:, :H])
    z = jax.nn.sigmoid(gi[:, H:2 * H] + gh[:, H:2 * H])
    n = jnp.tanh(gi[:, 2 * H:] + r * gh[:, 2 * H:])
    h_new = (1.0 - z) * n + z * h
    out = h_new @ params["fc_w"].T + params["fc_b"]
    return out, h_new.reshape(NUM_LAYERS, 1, HIDDEN_SIZE)


def init_params(key):
    """Deterministic init with PyTorch-default uniform(-1/sqrt(H), 1/sqrt(H))."""
    k = 1.0 / jnp.sqrt(jnp.float32(HIDDEN_SIZE))
    kf = 1.0 / jnp.sqrt(jnp.float32(HIDDEN_SIZE))   # fc fan_in = HIDDEN_SIZE
    keys = jax.random.split(key, 6)
    return {
        "w_ih": jax.random.uniform(keys[0], (3 * HIDDEN_SIZE, INPUT_SIZE),
                                   jnp.float32, -k, k),
        "w_hh": jax.random.uniform(keys[1], (3 * HIDDEN_SIZE, HIDDEN_SIZE),
                                   jnp.float32, -k, k),
        "b_ih": jax.random.uniform(keys[2], (3 * HIDDEN_SIZE,),
                                   jnp.float32, -k, k),
        "b_hh": jax.random.uniform(keys[3], (3 * HIDDEN_SIZE,),
                                   jnp.float32, -k, k),
        "fc_w": jax.random.uniform(keys[4], (NUM_CLASSES, HIDDEN_SIZE),
                                   jnp.float32, -kf, kf),
        "fc_b": jax.random.uniform(keys[5], (NUM_CLASSES,),
                                   jnp.float32, -kf, kf),
    }


if __name__ == "__main__":
    key = jax.random.PRNGKey(0)
    pkey, xkey1, xkey2 = jax.random.split(key, 3)

    params = init_params(pkey)
    prepped = prepare_params(params)        # one-time weight packing (hoisted)
    prepped = jax.tree_util.tree_map(jax.block_until_ready, prepped)

    x1 = jax.random.normal(xkey1, (1, 1, INPUT_SIZE), jnp.float32)  # viewed (1,1,-1)
    x2 = jax.random.normal(xkey2, (1, 1, INPUT_SIZE), jnp.float32)
    hidden0 = jnp.zeros((NUM_LAYERS, 1, HIDDEN_SIZE), jnp.float32)

    fwd = jax.jit(rnn_forward)

    # Step 1 (zero hidden) and step 2 (chained hidden) to exercise recurrence.
    out1, hid1 = fwd(x1, hidden0, prepped)
    out2, hid2 = fwd(x2, hid1, prepped)
    out1, hid1, out2, hid2 = jax.block_until_ready((out1, hid1, out2, hid2))

    ref_out1, ref_hid1 = rnn_forward_ref(x1, hidden0, params)
    ref_out2, ref_hid2 = rnn_forward_ref(x2, ref_hid1, params)

    assert out1.shape == (1, NUM_CLASSES)
    assert hid1.shape == (NUM_LAYERS, 1, HIDDEN_SIZE)
    assert jnp.allclose(out1, ref_out1, atol=1e-5, rtol=1e-5)
    assert jnp.allclose(hid1, ref_hid1, atol=1e-5, rtol=1e-5)
    assert jnp.allclose(out2, ref_out2, atol=1e-5, rtol=1e-5)
    assert jnp.allclose(hid2, ref_hid2, atol=1e-5, rtol=1e-5)

    print("KERNEL_OK")
</pallas_src>

<mosaic_0001>
module attributes {stable_mosaic.version = 11 : i64} {
  func.func @gru_fc_kernel(%arg0: memref<1x25xf32, #tpu.memory_space<vmem>>, %arg1: memref<25x640xf32, #tpu.memory_space<vmem>>, %arg2: memref<128x128xf32, #tpu.memory_space<vmem>>, %arg3: memref<1x128xf32, #tpu.memory_space<vmem>>, %arg4: memref<1x256xf32, #tpu.memory_space<vmem>>) attributes {dimension_semantics = [], scalar_prefetch = 0 : i64, scratch_operands = 0 : i64, tpu.core_type = #tpu.core_type<tc>} {
    %c0 = arith.constant 0 : index
    %c0_0 = arith.constant 0 : index
    %0 = vector.load %arg0[%c0, %c0_0] : memref<1x25xf32, #tpu.memory_space<vmem>>, vector<1x25xf32>
    %c0_1 = arith.constant 0 : index
    %c0_2 = arith.constant 0 : index
    %1 = vector.load %arg1[%c0_1, %c0_2] : memref<25x640xf32, #tpu.memory_space<vmem>>, vector<25x640xf32>
    %cst = arith.constant dense<0.000000e+00> : vector<1x640xf32>
    %2 = tpu.matmul %0, %1, %cst {dimension_numbers = #tpu.dot_dimension_numbers<[1], [0], [0], [1], [0, 0, 1, 1], [], []>} : vector<1x25xf32>, vector<25x640xf32>, vector<1x640xf32> -> vector<1x640xf32>
    %3 = vector.extract_strided_slice %2 {offsets = [0, 0], sizes = [1, 128], strides = [1, 1]} : vector<1x640xf32> to vector<1x128xf32>
    %4 = vector.extract_strided_slice %2 {offsets = [0, 128], sizes = [1, 128], strides = [1, 1]} : vector<1x640xf32> to vector<1x128xf32>
    %5 = vector.extract_strided_slice %2 {offsets = [0, 256], sizes = [1, 128], strides = [1, 1]} : vector<1x640xf32> to vector<1x128xf32>
    %6 = vector.extract_strided_slice %2 {offsets = [0, 384], sizes = [1, 128], strides = [1, 1]} : vector<1x640xf32> to vector<1x128xf32>
    %7 = vector.extract_strided_slice %2 {offsets = [0, 512], sizes = [1, 128], strides = [1, 1]} : vector<1x640xf32> to vector<1x128xf32>
    %8 = arith.negf %3 : vector<1x128xf32>
    %9 = math.exp %8 : vector<1x128xf32>
    %cst_3 = arith.constant 1.000000e+00 : f32
    %10 = vector.broadcast %cst_3 : f32 to vector<1x128xf32>
    %11 = arith.addf %10, %9 : vector<1x128xf32>
    %12 = arith.divf %10, %11 : vector<1x128xf32>
    %13 = arith.negf %4 : vector<1x128xf32>
    %14 = math.exp %13 : vector<1x128xf32>
    %cst_4 = arith.constant 1.000000e+00 : f32
    %15 = vector.broadcast %cst_4 : f32 to vector<1x128xf32>
    %16 = arith.addf %15, %14 : vector<1x128xf32>
    %17 = arith.divf %15, %16 : vector<1x128xf32>
    %18 = arith.mulf %12, %6 : vector<1x128xf32>
    %19 = arith.addf %5, %18 : vector<1x128xf32>
    %20 = math.tanh %19 : vector<1x128xf32>
    %21 = arith.subf %7, %20 : vector<1x128xf32>
    %22 = arith.mulf %17, %21 : vector<1x128xf32>
    %23 = arith.addf %20, %22 : vector<1x128xf32>
    %c0_5 = arith.constant 0 : index
    %c0_6 = arith.constant 0 : index
    %24 = vector.load %arg2[%c0_5, %c0_6] : memref<128x128xf32, #tpu.memory_space<vmem>>, vector<128x128xf32>
    %cst_7 = arith.constant dense<0.000000e+00> : vector<1x128xf32>
    %25 = tpu.matmul %23, %24, %cst_7 {dimension_numbers = #tpu.dot_dimension_numbers<[1], [0], [0], [1], [0, 0, 1, 1], [], []>} : vector<1x128xf32>, vector<128x128xf32>, vector<1x128xf32> -> vector<1x128xf32>
    %c0_8 = arith.constant 0 : index
    %c0_9 = arith.constant 0 : index
    %26 = vector.load %arg3[%c0_8, %c0_9] : memref<1x128xf32, #tpu.memory_space<vmem>>, vector<1x128xf32>
    %27 = arith.addf %25, %26 : vector<1x128xf32>
    %c0_10 = arith.constant 0 : index
    %c0_11 = arith.constant 0 : index
    %28 = vector.load %arg4[%c0_10, %c0_11] : memref<1x256xf32, #tpu.memory_space<vmem>>, vector<1x128xf32>
    tpu.vector_store %arg4[%c0_10, %c0_11], %27 {strides = array<i32>} : memref<1x256xf32, #tpu.memory_space<vmem>>, vector<1x128xf32>,
    %c0_12 = arith.constant 0 : index
    %c128 = arith.constant 128 : index
    %29 = vector.load %arg4[%c0_12, %c128] : memref<1x256xf32, #tpu.memory_space<vmem>>, vector<1x128xf32>
    tpu.vector_store %arg4[%c0_12, %c128], %23 {strides = array<i32>} : memref<1x256xf32, #tpu.memory_space<vmem>>, vector<1x128xf32>,
    return
  }
}

</mosaic_0001>

<bundles_post_ra>
// kernel: rnn_forward.1
= control target key start
LH: loop header
LB: loop body
LE: loop exit
PB: predicated region body
PF: predicated region fallthrough
CT: control target
= control target key end

     0   :  { %9 = vsyncpa [#allocation3], 0  ;;  %s422_s0 = inlined_call_operand.vmem [shape: f32[1,25], index: 0, kind: input, shape index: {}]   ;;  %s423_s1 = inlined_call_operand.hbm [shape: f32[25,640], index: 1, kind: input, shape index: {}]   ;;  %s424_s2 = inlined_call_operand.hbm [shape: f32[128,128], index: 2, kind: input, shape index: {}]   ;;  %s425_s3 = inlined_call_operand.vmem [shape: f32[1,128], index: 3, kind: input, shape index: {}]   ;;  %s426_s4 = inlined_call_operand.vmem [shape: f32[1,256], index: 4, kind: output, shape index: {}]  }
   0x1   :  { %s17_s17 = sshll.u32 %s423_s1, 4  ;;  %s18_s17 = int_to_ptr.hbm [resolvable:$true] %s17_s17 }
   0x2   :  { %10 = vsyncpa [#allocation5], 0  ;;  %s363_s18 = smov [#allocation2]   ;;  %s30_s22 = sshll.u32 %s424_s2, 4  ;;  %s31_s22 = int_to_ptr.hbm [resolvable:$true] %s30_s22 }
   0x3   :  { %s19_s19 = sshll.u32 %s363_s18, 4  ;;  %s364_s23 = smov 640   ;;  %s20_s19 = int_to_ptr.vmem [resolvable:$true] %s19_s19 }
   0x4   :  { %s365_s24 = smov 40   ;;  %s366_s25 = smov [#allocation4]  }
   0x5   :  { %25 = dma.hbm_to_vmem [thread:$0]  %s18_s17, 2560, %s20_s19, [#allocation3], %s364_s23, %s364_s23, %s365_s24  }
   0x6   :  { %s32_s26 = sshll.u32 %s366_s25, 4  ;;  %s367_s27 = smov 128   ;;  %s33_s26 = int_to_ptr.vmem [resolvable:$true] %s32_s26 }
   0x7   :  { %s368_s28 = smov 8  }
   0x8   :  { %38 = dma.hbm_to_vmem [thread:$0]  %s31_s22, 2048, %s33_s26, [#allocation5], %s367_s27, %s367_s27, %s368_s28  }
   0x9   :  { %359 = dma.done.wait [#allocation3], 2560  }
   0xa   :  { %360 = vsyncadd [#allocation3], 4294964736 }
   0xb   :  { %361 = dma.done.wait [#allocation5], 2048  }
   0xc   :  { %362 = vsyncadd [#allocation5], 4294965248  ;;  %vm74_vm0 = vcmask 1040384   ;;  %v65_v0 = vld [vmem:[#allocation2 + $0x78] sm:$0x1]  ;;  %v60_v2 = vld [vmem:[#allocation2 + $0x50] sm:$0xff] }
   0xd   :  { %v66_v1 = vld [vmem:[#allocation2 + $0x80] sm:$0x1]  ;;  %283 = vmatpush.msk.msra.mxu0 %vm74_vm0, %v65_v0  ;;  %v61_v3 = vld [vmem:[#allocation2 + $0x58] sm:$0xff]  ;;  %v55_v4 = vld [vmem:[#allocation2 + $0x28] sm:$0xff]  ;;  %vm70_vm1 = vcmask 203776  }
   0xe   :  { %285 = vmatpush.msk.msra.mxu2 %vm74_vm0, %v66_v1  ;;  %v56_v5 = vld [vmem:[#allocation2 + $0x30] sm:$0xff]  ;;  %v63_v7 = vld [vmem:[#allocation2 + $0x68] sm:$0xff]  ;;  %v50_v8 = vld [vmem:[#allocation2] sm:$0xff] }
   0xf   :  { %103 = vmatpush.msra.mxu0 %v60_v2  ;;  %v68_v6 = vld [vmem:[#allocation2 + $0x90] sm:$0x1]  ;;  %v51_v9 = vld [vmem:[#allocation2 + $0x8] sm:$0xff]  ;;  %v49_v10 = vld [vmem:[%s422_s0] sm:$0x1] }
  0x10   :  { %123 = vmatpush.msra.mxu2 %v61_v3  ;;  %289 = vmatpush.msk.msra.mxu3 %vm74_vm0, %v68_v6  ;;  %v67_v11 = vld [vmem:[#allocation2 + $0x88] sm:$0x1]  ;;  %v58_v12 = vld [vmem:[#allocation2 + $0x40] sm:$0xff]  ;;  %v69_v13 = vld [vmem:[#allocation2 + $0x98] sm:$0x1]  ;;  %v271_v6 = vlaneseq }
  0x11   :  { %104 = vmatpush.msra.mxu0 %v55_v4  ;;  %v62_v14 = vld [vmem:[#allocation2 + $0x60] sm:$0xff]  ;;  %v53_v15 = vld [vmem:[#allocation2 + $0x18] sm:$0xff]  ;;  %v64_v16 = vld [vmem:[#allocation2 + $0x70] sm:$0xff] }
  0x12   :  { %124 = vmatpush.msra.mxu2 %v56_v5  ;;  %163 = vmatpush.msra.mxu3 %v63_v7  ;;  %v57_v17 = vld [vmem:[#allocation2 + $0x38] sm:$0xff]  ;;  %v59_v18 = vld [vmem:[#allocation2 + $0x48] sm:$0xff]  ;;  %v52_v19 = vld [vmem:[#allocation2 + $0x10] sm:$0xff]  ;;  %vm273_vm10 = vcmp.lt.s32.totalorder %v271_v6, 128 }
  0x13   :  { %105 = vmatpush.msra.mxu0 %v50_v8  ;;  %v54_v20 = vld [vmem:[#allocation2 + $0x20] sm:$0xff]  ;;  %v249_v21 = vld [vmem:[#allocation4 + $0x78] sm:$0xff]  ;;  %v248_v22 = vld [vmem:[#allocation4 + $0x70] sm:$0xff] }
  0x14   :  { %125 = vmatpush.msra.mxu2 %v51_v9  ;;  %284 = vmatmul.msk.f32.vlgmr.msra.gmra.mxu0 %vm70_vm1, %v49_v10  ;;  %v247_v23 = vld [vmem:[#allocation4 + $0x68] sm:$0xff]  ;;  %v246_v24 = vld [vmem:[#allocation4 + $0x60] sm:$0xff]  ;;  %v245_v25 = vld [vmem:[#allocation4 + $0x58] sm:$0xff] }
  0x15   :  { %286 = vmatmul.msk.f32.vlgmr.msra.gmra.mxu2 %vm70_vm1, %v49_v10  ;;  %164 = vmatpush.msra.mxu3 %v58_v12  ;;  %v244_v26 = vld [vmem:[#allocation4 + $0x50] sm:$0xff]  ;;  %v243_v27 = vld [vmem:[#allocation4 + $0x48] sm:$0xff]  ;;  %v242_v28 = vld [vmem:[#allocation4 + $0x40] sm:$0xff] }
  0x16   :  { %287 = vmatpush.msk.msrb.mxu2 %vm74_vm0, %v67_v11  ;;  %291 = vmatpush.msk.msrb.mxu0 %vm74_vm0, %v69_v13  ;;  %v241_v29 = vld [vmem:[#allocation4 + $0x38] sm:$0xff]  ;;  %v240_v31 = vld [vmem:[#allocation4 + $0x30] sm:$0xff]  ;;  %v239_v33 = vld [vmem:[#allocation4 + $0x28] sm:$0xff] }
  0x17   :  { %165 = vmatpush.msra.mxu3 %v53_v15  ;;  %251 = vmatpush.msra.mxu1 %v249_v21  ;;  %v238_v34 = vld [vmem:[#allocation4 + $0x20] sm:$0xff]  ;;  %v237_v36 = vld [vmem:[#allocation4 + $0x18] sm:$0xff]  ;;  %v236_v38 = vld [vmem:[#allocation4 + $0x10] sm:$0xff] }
  0x18   :  { %143 = vmatpush.msrb.mxu2 %v62_v14  ;;  %290 = vmatmul.msk.f32.vlgmr.msra.gmra.mxu3 %vm70_vm1, %v49_v10  ;;  %v235_v41 = vld [vmem:[#allocation4 + $0x8] sm:$0xff]  ;;  %v234_v42 = vld [vmem:[#allocation4] sm:$0xff] }
  0x19   :  { %183 = vmatpush.msrb.mxu0 %v64_v16  ;;  %252 = vmatpush.msra.mxu1 %v248_v22  ;;  %v250_v11 = vld [vmem:[%s425_s3] sm:$0x1] }
  0x1a   :  { %144 = vmatpush.msrb.mxu2 %v57_v17 }
  0x1b   :  { %184 = vmatpush.msrb.mxu0 %v59_v18  ;;  %253 = vmatpush.msra.mxu1 %v247_v23 }
  0x1c   :  { %145 = vmatpush.msrb.mxu2 %v52_v19 }
  0x1d   :  { %288 = vmatmul.msk.f32.vlgmr.msrb.gmra.mxu2 %vm70_vm1, %v49_v10  ;;  %185 = vmatpush.msrb.mxu0 %v54_v20 }
  0x1e   :  { %292 = vmatmul.msk.f32.vlgmr.msrb.gmra.mxu0 %vm70_vm1, %v49_v10  ;;  %254 = vmatpush.msra.mxu1 %v246_v24 }
  0x20   :  { %255 = vmatpush.msra.mxu1 %v245_v25 }
  0x22   :  { %256 = vmatpush.msra.mxu1 %v244_v26 }
  0x24   :  { %257 = vmatpush.msra.mxu1 %v243_v27 }
  0x26   :  { %258 = vmatpush.msra.mxu1 %v242_v28 }
  0x28   :  { %259 = vmatpush.msra.mxu1 %v241_v29 }
  0x2a   :  { %260 = vmatpush.msra.mxu1 %v240_v31 }
  0x2c   :  { %261 = vmatpush.msra.mxu1 %v239_v33 }
  0x2e   :  { %262 = vmatpush.msra.mxu1 %v238_v34 }
  0x30   :  { %263 = vmatpush.msra.mxu1 %v237_v36 }
  0x32   :  { %264 = vmatpush.msra.mxu1 %v236_v38 }
  0x34   :  { %265 = vmatpush.msra.mxu1 %v235_v41 }
  0x36   :  { %266 = vmatpush.msra.mxu1 %v234_v42 }
  0x91   :  { %v107_v30 = vpop.f32.mrf.mxu0 }
  0x92   :  { %v293_v32 = vmul.f32 -1.442695, %v107_v30 }
  0x94   :  { %301 = vpow2.f32 %v293_v32 }
  0x98   :  { %v127_v35 = vpop.f32.mrf.mxu2 }
  0x99   :  { %v294_v37 = vmul.f32 -1.442695, %v127_v35 }
  0x9a   :  { %v302_v39 = vpop.eup %301 }
  0x9b   :  { %303 = vpow2.f32 %v294_v37  ;;  %v193_v40 = vadd.f32 1.0, %v302_v39  ;;  %v167_v54 = vpop.f32.mrf.mxu3  ;;  %v187_v2 = vpop.f32.mrf.mxu0 }
  0x9d   :  { %305 = vrcp.f32 %v193_v40  ;;  %v205_v48 = vand.u32 2147483648, %v193_v40  ;;  %v203_v50 = vand.u32 2147483647, %v193_v40  ;;  %vm199_vm3 = vweird.f32 %v193_v40 }
  0x9f   :  { %v206_v55 = vor.u32 1.1754944e-38, %v205_v48  ;;  %vm204_vm5 = vcmp.eq.f32.partialorder %v203_v50, 8.507059e+37 }
  0xa0   :  { %v147_v59 = vpop.f32.mrf.mxu2 }
  0xa1   :  { %v304_v43 = vpop.eup %303 }
  0xa2   :  { %v212_v44 = vadd.f32 1.0, %v304_v43 }
  0xa3   :  { %v306_v45 = vpop.eup %305 }
  0xa4   :  { %307 = vrcp.f32 %v212_v44  ;;  %v195_v46 = vmul.f32 %v306_v45, %v193_v40  ;;  %vm200_vm2 = vweird.f32 %v306_v45  ;;  %vm218_vm6 = vweird.f32 %v212_v44 }
  0xa5   :  { %vm201_vm4 = vmor %vm199_vm3, %vm200_vm2  ;;  %v224_v0 = vand.u32 2147483648, %v212_v44  ;;  %v222_v1 = vand.u32 2147483647, %v212_v44 }
  0xa6   :  { %v196_v47 = vsub.f32 1.0, %v195_v46 }
  0xa7   :  { %v225_v5 = vor.u32 1.1754944e-38, %v224_v0  ;;  %vm223_vm9 = vcmp.eq.f32.partialorder %v222_v1, 8.507059e+37 }
  0xa8   :  { %v197_v49 = vmul.f32 %v306_v45, %v196_v47 }
  0xaa   :  { %v308_v51 = vpop.eup %307  ;;  %v198_v52 = vadd.f32 %v306_v45, %v197_v49 }
  0xab   :  { %v214_v53 = vmul.f32 %v308_v51, %v212_v44  ;;  %vm219_vm7 = vweird.f32 %v308_v51 }
  0xac   :  { %v202_v56 = vsel %vm201_vm4, %v306_v45, %v198_v52  ;;  %vm220_vm8 = vmor %vm218_vm6, %vm219_vm7 }
  0xad   :  { %v215_v57 = vsub.f32 1.0, %v214_v53  ;;  %v207_v58 = vsel %vm204_vm5, %v206_v55, %v202_v56 }
  0xae   :  { %v228_v60 = vmul.f32 %v207_v58, %v167_v54 }
  0xaf   :  { %v216_v61 = vmul.f32 %v308_v51, %v215_v57 }
  0xb0   :  { %v229_v62 = vadd.f32 %v228_v60, %v147_v59 }
  0xb1   :  { %v217_v63 = vadd.f32 %v308_v51, %v216_v61 }
  0xb2   :  { %309 = vtanh.f32 %v229_v62 }
  0xb3   :  { %v221_v3 = vsel %vm220_vm8, %v308_v51, %v217_v63 }
  0xb4   :  { %v226_v8 = vsel %vm223_vm9, %v225_v5, %v221_v3 }
  0xb8   :  { %v310_v4 = vpop.eup %309 }
  0xb9   :  { %v231_v7 = vsub.f32 %v187_v2, %v310_v4 }
  0xbb   :  { %v232_v9 = vmul.f32 %v231_v7, %v226_v8 }
  0xbd   :  { %v233_v10 = vadd.f32 %v310_v4, %v232_v9 }
  0xbf   :  { %267 = vmatmul.f32.vlgmr.msra.gmra.mxu1 %v233_v10  ;;  %276 = vst.msk [vmem:[%s426_s4 + $0x1] sm:$0x1] %vm273_vm10, %v233_v10 }
 0x13c   :  { %v268_v12 = vpop.f32.mrf.mxu1 }
 0x13d   :  { %v269_v13 = vadd.f32 %v268_v12, %v250_v11 }
 0x13f   :  { %275 = vst.msk [vmem:[%s426_s4] sm:$0x1] %vm273_vm10, %v269_v13 }
 0x140   :  { %281 = vsyncpa [#allocation3], 1 }
 0x141   :  { %282 = vsyncpa [#allocation5], 1 }

</bundles_post_ra>
